<compile_context>
chip_gen: v5e
topology: v5e:2x2
jax: 0.10.0
libtpu: 0.0.40
codegen_flags: <defaults>
</compile_context>

<pallas_src>
import jax
import jax.numpy as jnp
from jax.experimental import pallas as pl
from jax.experimental.pallas import tpu as pltpu


FEATS = 32
HEAD = 8
HEAD_DIM = FEATS // HEAD
SQRT_D = float(FEATS) ** 0.5   # NOTE: module scales by sqrt(feats), not sqrt(head_dim)


def _mhsa_kernel(x_ref, wqkv_ref, bqkv_ref, wo_ref, bo_ref, hmask_ref, segsum_ref,
                 o_ref):
    TB, N, F = x_ref.shape
    H = HEAD
    HN = H * N           # 64: the lane-heavy attention axis
    M = TB * N           # projection rows

    # ---- fused QKV projection (bf16 operands, f32 accumulate) ---------------
    # 1/sqrt(feats) is folded into the Q columns of wqkv / bqkv in the wrapper.
    x2 = x_ref[...].reshape(M, F)
    qkv = jnp.dot(x2.astype(jnp.bfloat16), wqkv_ref[...],
                  preferred_element_type=jnp.float32) + bqkv_ref[...]   # (M, 3F) f32
    q3 = qkv[:, :F].reshape(TB, N, F)
    k3 = qkv[:, F:2 * F].reshape(TB, N, F)
    v3 = qkv[:, 2 * F:3 * F].reshape(TB, N, F)

    # ---- head-masked K / V with m = h*N + j on the second-minor axis --------
    hmask = hmask_ref[...]                                   # (H, F) f32, resident
    km = (k3[:, None, :, :] * hmask[None, :, None, :]).reshape(TB, HN, F)
    vm = (v3[:, None, :, :] * hmask[None, :, None, :]).reshape(TB, HN, F)

    # scores[t, i, h*N + j] = sum_{f in head h} q_scaled[t,i,f] * k[t,j,f]
    s = jnp.einsum('tif,tmf->tim',
                   q3.astype(jnp.bfloat16), km.astype(jnp.bfloat16),
                   preferred_element_type=jnp.float32)       # (TB, N, HN) f32

    # softmax per head segment; subtracting the global row max is a constant
    # shift within each segment, so per-segment softmax is unchanged.
    s = s - jnp.max(s, axis=-1, keepdims=True)
    p = jnp.exp(s)                                           # f32 (EUP)
    # per-segment denominator via block-diagonal ones matrix (MXU, M filled)
    denom = jnp.dot(p.reshape(M, HN), segsum_ref[...],
                    preferred_element_type=jnp.float32).reshape(TB, N, HN)
    p = p * pl.reciprocal(denom, approx=True)

    # attn[t,i,f] = sum_j p[t,i,h_f*N+j] * v[t,j,f]; the mask baked into vm
    # selects head h_f for feature f, yielding the concat-of-heads layout.
    attn = jnp.einsum('tim,tmf->tif',
                      p.astype(jnp.bfloat16), vm.astype(jnp.bfloat16),
                      preferred_element_type=jnp.float32)    # (TB, N, F)

    # ---- output projection ---------------------------------------------------
    out = jnp.dot(attn.reshape(M, F).astype(jnp.bfloat16), wo_ref[...],
                  preferred_element_type=jnp.float32) + bo_ref[...]     # (M, F)
    o_ref[...] = out.reshape(TB, N, F).astype(o_ref.dtype)


def _choose_tb(B, cap=128):
    """Largest batch tile <= cap that divides B; prefer >= 2 grid steps (v7x)."""
    divs = [d for d in range(1, min(B, cap) + 1) if B % d == 0]
    tb = divs[-1]
    if B >= 2 and B // tb < 2:
        two_step = [d for d in divs if B // d >= 2]
        if two_step:
            tb = two_step[-1]
    return tb


@jax.jit
def mhsa_pallas(x, wq, bq, wk, bk, wv, bv, wo, bo):
    B, N, F = x.shape
    assert F == FEATS
    H, HN = HEAD, HEAD * N
    scale = 1.0 / SQRT_D

    # Fused QKV weights (scale folded into Q), bf16 matmul operands, f32 biases.
    wqkv = jnp.concatenate([wq.T * scale, wk.T, wv.T], axis=1).astype(jnp.bfloat16)
    bqkv = jnp.concatenate([bq * scale, bk, bv]).reshape(1, 3 * F)       # f32
    wo_t = wo.T.astype(jnp.bfloat16)
    bo_r = bo.reshape(1, F)                                              # f32

    # Hoisted constants (resident in VMEM via constant index_maps).
    hmask = (jnp.arange(F)[None, :] // HEAD_DIM ==
             jnp.arange(H)[:, None]).astype(jnp.float32)                 # (H, F)
    mi = jnp.arange(HN)
    segsum = (mi[:, None] // N == mi[None, :] // N).astype(jnp.float32)  # (HN, HN)

    # Batch tile: divisor of B (no pad copy), >= 2 steps when B >= 2 (v7x 2 TCs).
    TB = _choose_tb(B)
    if TB < 8 and B > 16:
        # Awkward B (e.g. large prime): pad instead of running tiny tiles.
        TB = min(128, pl.cdiv(B, 2))
    Bp = pl.cdiv(B, TB) * TB
    xp = x if Bp == B else jnp.pad(x, ((0, Bp - B), (0, 0), (0, 0)))

    const = lambda b: (0, 0)
    out = pl.pallas_call(
        _mhsa_kernel,
        out_shape=jax.ShapeDtypeStruct((Bp, N, F), x.dtype),
        grid_spec=pltpu.PrefetchScalarGridSpec(
            num_scalar_prefetch=0,
            grid=(Bp // TB,),
            in_specs=[
                pl.BlockSpec((TB, N, F), lambda b: (b, 0, 0)),   # x (batch tile)
                pl.BlockSpec((F, 3 * F), const),                 # fused QKV weight
                pl.BlockSpec((1, 3 * F), const),                 # fused QKV bias
                pl.BlockSpec((F, F), const),                     # output weight
                pl.BlockSpec((1, F), const),                     # output bias
                pl.BlockSpec((H, F), const),                     # head mask
                pl.BlockSpec((HN, HN), const),                   # segment-sum matrix
            ],
            out_specs=pl.BlockSpec((TB, N, F), lambda b: (b, 0, 0)),
        ),
        compiler_params=pltpu.CompilerParams(
            dimension_semantics=("parallel",),
            vmem_limit_bytes=48 * 1024 * 1024,
        ),
    )(xp, wqkv, bqkv, wo_t, bo_r, hmask, segsum)

    return out[:B] if Bp != B else out


def mhsa_reference(x, wq, bq, wk, bk, wv, bv, wo, bo):
    """Pure-JAX f32 reference mirroring the PyTorch forward exactly."""
    B, N, F = x.shape
    q = (x @ wq.T + bq).reshape(B, N, HEAD, HEAD_DIM).transpose(0, 2, 1, 3)
    k = (x @ wk.T + bk).reshape(B, N, HEAD, HEAD_DIM).transpose(0, 2, 1, 3)
    v = (x @ wv.T + bv).reshape(B, N, HEAD, HEAD_DIM).transpose(0, 2, 1, 3)
    score = jax.nn.softmax(jnp.einsum('bhif,bhjf->bhij', q, k) / SQRT_D, axis=-1)
    attn = jnp.einsum('bhij,bhjf->bihf', score, v)              # (B, N, H, HD)
    o = attn.reshape(B, N, F) @ wo.T + bo
    return o   # dropout(p=0.0) is identity


if __name__ == "__main__":
    key = jax.random.PRNGKey(0)
    B, N = 2, 8
    keys = jax.random.split(key, 9)

    x = jax.random.normal(keys[0], (B, N, FEATS), dtype=jnp.float32)

    def init_linear(kw, kb):
        # Deterministic, PyTorch-Linear-shaped params: W (out,in), b (out,)
        bound = 1.0 / (FEATS ** 0.5)
        w = jax.random.uniform(kw, (FEATS, FEATS), jnp.float32, -bound, bound)
        b = jax.random.uniform(kb, (FEATS,), jnp.float32, -bound, bound)
        return w, b

    wq, bq = init_linear(keys[1], keys[2])
    wk, bk = init_linear(keys[3], keys[4])
    wv, bv = init_linear(keys[5], keys[6])
    wo, bo = init_linear(keys[7], keys[8])

    out = mhsa_pallas(x, wq, bq, wk, bk, wv, bv, wo, bo)
    out = jax.block_until_ready(out)

    ref = mhsa_reference(x, wq, bq, wk, bk, wv, bv, wo, bo)
    assert out.shape == (B, N, FEATS)
    # tolerance accounts for bf16 MXU operands (x, weights, p, v) and the
    # approximate EUP reciprocal in the softmax denominator
    assert jnp.allclose(out, ref, atol=3e-2, rtol=3e-2), "mismatch vs reference"

    print("KERNEL_OK")
</pallas_src>

<mosaic_0001>
module attributes {stable_mosaic.version = 11 : i64} {
  func.func @_mhsa_kernel(%arg0: i32, %arg1: memref<1x8x32xf32, #tpu.memory_space<vmem>>, %arg2: memref<32x96xbf16, #tpu.memory_space<vmem>>, %arg3: memref<1x96xf32, #tpu.memory_space<vmem>>, %arg4: memref<32x32xbf16, #tpu.memory_space<vmem>>, %arg5: memref<1x32xf32, #tpu.memory_space<vmem>>, %arg6: memref<8x32xf32, #tpu.memory_space<vmem>>, %arg7: memref<64x64xf32, #tpu.memory_space<vmem>>, %arg8: memref<1x8x32xf32, #tpu.memory_space<vmem>>) attributes {dimension_semantics = [#tpu.dimension_semantics<parallel>], iteration_bounds = array<i64: 2>, scalar_prefetch = 0 : i64, scratch_operands = 0 : i64, tpu.core_type = #tpu.core_type<tc>, window_params = [{transform_indices = @transform_0, window_bounds = array<i64: 1, 8, 32>}, {pipeline_mode = #tpu.pipeline_mode<synchronous>, transform_indices = @transform_1, window_bounds = array<i64: 32, 96>}, {pipeline_mode = #tpu.pipeline_mode<synchronous>, transform_indices = @transform_2, window_bounds = array<i64: 1, 96>}, {pipeline_mode = #tpu.pipeline_mode<synchronous>, transform_indices = @transform_3, window_bounds = array<i64: 32, 32>}, {pipeline_mode = #tpu.pipeline_mode<synchronous>, transform_indices = @transform_4, window_bounds = array<i64: 1, 32>}, {pipeline_mode = #tpu.pipeline_mode<synchronous>, transform_indices = @transform_5, window_bounds = array<i64: 8, 32>}, {pipeline_mode = #tpu.pipeline_mode<synchronous>, transform_indices = @transform_6, window_bounds = array<i64: 64, 64>}, {transform_indices = @transform_7, window_bounds = array<i64: 1, 8, 32>}]} {
    %c0 = arith.constant 0 : index
    %c0_0 = arith.constant 0 : index
    %c0_1 = arith.constant 0 : index
    %0 = vector.load %arg1[%c0, %c0_0, %c0_1] : memref<1x8x32xf32, #tpu.memory_space<vmem>>, vector<1x8x32xf32>
    %1 = vector.shape_cast %0 : vector<1x8x32xf32> to vector<8x32xf32>
    %2 = arith.truncf %1 : vector<8x32xf32> to vector<8x32xbf16>
    %c0_2 = arith.constant 0 : index
    %c0_3 = arith.constant 0 : index
    %3 = vector.load %arg2[%c0_2, %c0_3] : memref<32x96xbf16, #tpu.memory_space<vmem>>, vector<32x96xbf16>
    %cst = arith.constant dense<0.000000e+00> : vector<8x96xf32>
    %4 = tpu.matmul %2, %3, %cst {dimension_numbers = #tpu.dot_dimension_numbers<[1], [0], [0], [1], [0, 0, 1, 1], [], []>} : vector<8x32xbf16>, vector<32x96xbf16>, vector<8x96xf32> -> vector<8x96xf32>
    %c0_4 = arith.constant 0 : index
    %c0_5 = arith.constant 0 : index
    %5 = vector.load %arg3[%c0_4, %c0_5] : memref<1x96xf32, #tpu.memory_space<vmem>>, vector<1x96xf32>
    %6 = vector.broadcast %5 : vector<1x96xf32> to vector<8x96xf32>
    %7 = arith.addf %4, %6 : vector<8x96xf32>
    %8 = vector.extract_strided_slice %7 {offsets = [0, 0], sizes = [8, 32], strides = [1, 1]} : vector<8x96xf32> to vector<8x32xf32>
    %9 = vector.shape_cast %8 : vector<8x32xf32> to vector<1x8x32xf32>
    %10 = vector.extract_strided_slice %7 {offsets = [0, 32], sizes = [8, 32], strides = [1, 1]} : vector<8x96xf32> to vector<8x32xf32>
    %11 = vector.shape_cast %10 : vector<8x32xf32> to vector<1x8x32xf32>
    %12 = vector.extract_strided_slice %7 {offsets = [0, 64], sizes = [8, 32], strides = [1, 1]} : vector<8x96xf32> to vector<8x32xf32>
    %13 = vector.shape_cast %12 : vector<8x32xf32> to vector<1x8x32xf32>
    %c0_6 = arith.constant 0 : index
    %c0_7 = arith.constant 0 : index
    %14 = vector.load %arg6[%c0_6, %c0_7] : memref<8x32xf32, #tpu.memory_space<vmem>>, vector<8x32xf32>
    %15 = vector.shape_cast %11 : vector<1x8x32xf32> to vector<1x1x8x32xf32>
    %16 = vector.shape_cast %14 : vector<8x32xf32> to vector<1x8x1x32xf32>
    %17 = vector.broadcast %15 : vector<1x1x8x32xf32> to vector<1x8x8x32xf32>
    %18 = vector.broadcast %16 : vector<1x8x1x32xf32> to vector<1x8x8x32xf32>
    %19 = arith.mulf %17, %18 : vector<1x8x8x32xf32>
    %20 = vector.shape_cast %19 : vector<1x8x8x32xf32> to vector<1x64x32xf32>
    %21 = vector.shape_cast %13 : vector<1x8x32xf32> to vector<1x1x8x32xf32>
    %22 = vector.shape_cast %14 : vector<8x32xf32> to vector<1x8x1x32xf32>
    %23 = vector.broadcast %21 : vector<1x1x8x32xf32> to vector<1x8x8x32xf32>
    %24 = vector.broadcast %22 : vector<1x8x1x32xf32> to vector<1x8x8x32xf32>
    %25 = arith.mulf %23, %24 : vector<1x8x8x32xf32>
    %26 = vector.shape_cast %25 : vector<1x8x8x32xf32> to vector<1x64x32xf32>
    %27 = arith.truncf %9 : vector<1x8x32xf32> to vector<1x8x32xbf16>
    %28 = arith.truncf %20 : vector<1x64x32xf32> to vector<1x64x32xbf16>
    "tpu.trace_start"() <{level = 10 : i32, message = "tif,tmf->tim"}> : () -> ()
    %cst_8 = arith.constant dense<0.000000e+00> : vector<1x8x64xf32>
    %29 = tpu.matmul %27, %28, %cst_8 {dimension_numbers = #tpu.dot_dimension_numbers<[2], [2], [1], [1], [0, 0, 0, 1, 1, 1], [0], [0]>} : vector<1x8x32xbf16>, vector<1x64x32xbf16>, vector<1x8x64xf32> -> vector<1x8x64xf32>
    "tpu.trace_stop"() : () -> ()
    %cst_9 = arith.constant dense<0xFF800000> : vector<1x8xf32>
    %30 = vector.multi_reduction <maximumf>, %29, %cst_9 [2] : vector<1x8x64xf32> to vector<1x8xf32>
    %31 = vector.shape_cast %30 : vector<1x8xf32> to vector<1x8x1xf32>
    %32 = vector.broadcast %31 : vector<1x8x1xf32> to vector<1x8x64xf32>
    %33 = arith.subf %29, %32 : vector<1x8x64xf32>
    %34 = math.exp %33 : vector<1x8x64xf32>
    %35 = vector.shape_cast %34 : vector<1x8x64xf32> to vector<8x64xf32>
    %c0_10 = arith.constant 0 : index
    %c0_11 = arith.constant 0 : index
    %36 = vector.load %arg7[%c0_10, %c0_11] : memref<64x64xf32, #tpu.memory_space<vmem>>, vector<64x64xf32>
    %cst_12 = arith.constant dense<0.000000e+00> : vector<8x64xf32>
    %37 = tpu.matmul %35, %36, %cst_12 {dimension_numbers = #tpu.dot_dimension_numbers<[1], [0], [0], [1], [0, 0, 1, 1], [], []>} : vector<8x64xf32>, vector<64x64xf32>, vector<8x64xf32> -> vector<8x64xf32>
    %38 = vector.shape_cast %37 : vector<8x64xf32> to vector<1x8x64xf32>
    %39 = tpu.reciprocal %38 {approx = true} : vector<1x8x64xf32> -> vector<1x8x64xf32>
    %40 = arith.mulf %34, %39 : vector<1x8x64xf32>
    %41 = arith.truncf %40 : vector<1x8x64xf32> to vector<1x8x64xbf16>
    %42 = arith.truncf %26 : vector<1x64x32xf32> to vector<1x64x32xbf16>
    "tpu.trace_start"() <{level = 10 : i32, message = "tim,tmf->tif"}> : () -> ()
    %cst_13 = arith.constant dense<0.000000e+00> : vector<1x8x32xf32>
    %43 = tpu.matmul %41, %42, %cst_13 {dimension_numbers = #tpu.dot_dimension_numbers<[2], [1], [1], [2], [0, 0, 0, 1, 1, 2], [0], [0]>} : vector<1x8x64xbf16>, vector<1x64x32xbf16>, vector<1x8x32xf32> -> vector<1x8x32xf32>
    "tpu.trace_stop"() : () -> ()
    %44 = vector.shape_cast %43 : vector<1x8x32xf32> to vector<8x32xf32>
    %45 = arith.truncf %44 : vector<8x32xf32> to vector<8x32xbf16>
    %c0_14 = arith.constant 0 : index
    %c0_15 = arith.constant 0 : index
    %46 = vector.load %arg4[%c0_14, %c0_15] : memref<32x32xbf16, #tpu.memory_space<vmem>>, vector<32x32xbf16>
    %cst_16 = arith.constant dense<0.000000e+00> : vector<8x32xf32>
    %47 = tpu.matmul %45, %46, %cst_16 {dimension_numbers = #tpu.dot_dimension_numbers<[1], [0], [0], [1], [0, 0, 1, 1], [], []>} : vector<8x32xbf16>, vector<32x32xbf16>, vector<8x32xf32> -> vector<8x32xf32>
    %c0_17 = arith.constant 0 : index
    %c0_18 = arith.constant 0 : index
    %48 = vector.load %arg5[%c0_17, %c0_18] : memref<1x32xf32, #tpu.memory_space<vmem>>, vector<1x32xf32>
    %49 = vector.broadcast %48 : vector<1x32xf32> to vector<8x32xf32>
    %50 = arith.addf %47, %49 : vector<8x32xf32>
    %51 = vector.shape_cast %50 : vector<8x32xf32> to vector<1x8x32xf32>
    %c0_19 = arith.constant 0 : index
    %c0_20 = arith.constant 0 : index
    %c0_21 = arith.constant 0 : index
    %52 = vector.load %arg8[%c0_19, %c0_20, %c0_21] : memref<1x8x32xf32, #tpu.memory_space<vmem>>, vector<1x8x32xf32>
    tpu.vector_store %arg8[%c0_19, %c0_20, %c0_21], %51 {strides = array<i32>} : memref<1x8x32xf32, #tpu.memory_space<vmem>>, vector<1x8x32xf32>,
    return
  }
  func.func @transform_0(%arg0: i32) -> (i32, i32, i32) {
    %c0_i32 = arith.constant 0 : i32
    %c0_i32_0 = arith.constant 0 : i32
    %c0_i32_1 = arith.constant 0 : i32
    return %arg0, %c0_i32, %c0_i32_0 : i32, i32, i32
  }
  func.func @transform_1(%arg0: i32) -> (i32, i32) {
    %c0_i32 = arith.constant 0 : i32
    %c0_i32_0 = arith.constant 0 : i32
    %c0_i32_1 = arith.constant 0 : i32
    return %c0_i32, %c0_i32_0 : i32, i32
  }
  func.func @transform_2(%arg0: i32) -> (i32, i32) {
    %c0_i32 = arith.constant 0 : i32
    %c0_i32_0 = arith.constant 0 : i32
    %c0_i32_1 = arith.constant 0 : i32
    return %c0_i32, %c0_i32_0 : i32, i32
  }
  func.func @transform_3(%arg0: i32) -> (i32, i32) {
    %c0_i32 = arith.constant 0 : i32
    %c0_i32_0 = arith.constant 0 : i32
    %c0_i32_1 = arith.constant 0 : i32
    return %c0_i32, %c0_i32_0 : i32, i32
  }
  func.func @transform_4(%arg0: i32) -> (i32, i32) {
    %c0_i32 = arith.constant 0 : i32
    %c0_i32_0 = arith.constant 0 : i32
    %c0_i32_1 = arith.constant 0 : i32
    return %c0_i32, %c0_i32_0 : i32, i32
  }
  func.func @transform_5(%arg0: i32) -> (i32, i32) {
    %c0_i32 = arith.constant 0 : i32
    %c0_i32_0 = arith.constant 0 : i32
    %c0_i32_1 = arith.constant 0 : i32
    return %c0_i32, %c0_i32_0 : i32, i32
  }
  func.func @transform_6(%arg0: i32) -> (i32, i32) {
    %c0_i32 = arith.constant 0 : i32
    %c0_i32_0 = arith.constant 0 : i32
    %c0_i32_1 = arith.constant 0 : i32
    return %c0_i32, %c0_i32_0 : i32, i32
  }
  func.func @transform_7(%arg0: i32) -> (i32, i32, i32) {
    %c0_i32 = arith.constant 0 : i32
    %c0_i32_0 = arith.constant 0 : i32
    %c0_i32_1 = arith.constant 0 : i32
    return %arg0, %c0_i32, %c0_i32_0 : i32, i32, i32
  }
}

</mosaic_0001>

<bundles_post_ra>
// kernel: mhsa_pallas.1
= control target key start
LH: loop header
LB: loop body
LE: loop exit
PB: predicated region body
PF: predicated region fallthrough
CT: control target
= control target key end

     0   :  { %12 = vsyncpa [#allocation3], 0  ;;  %s1055_s0 = inlined_call_operand.vmem [shape: f32[2,8,32], index: 0, kind: input, shape index: {}]   ;;  %s1056_s1 = inlined_call_operand.vmem [shape: bf16[32,96], index: 1, kind: input, shape index: {}]   ;;  %s1057_s2 = inlined_call_operand.vmem [shape: f32[1,96], index: 2, kind: input, shape index: {}]   ;;  %s1058_s3 = inlined_call_operand.vmem [shape: bf16[32,32], index: 3, kind: input, shape index: {}]   ;;  %s1059_s4 = inlined_call_operand.vmem [shape: f32[1,32], index: 4, kind: input, shape index: {}]   ;;  %s1060_s5 = inlined_call_operand.vmem [shape: f32[8,32], index: 5, kind: input, shape index: {}]   ;;  %s1061_s6 = inlined_call_operand.vmem [shape: f32[64,64], index: 6, kind: input, shape index: {}]   ;;  %s1062_s7 = inlined_call_operand.hbm [shape: f32[2,8,32], index: 7, kind: output, shape index: {}]  }
   0x1   :  { %14 = vsyncpa [#allocation3 + $0x1], 0  ;;  %s860_s24 = smov 0   ;;  %s862_s25 = smov 0  }
   0x2   :  { %s864_s26 = smov 0   ;;  %s866_s27 = smov 0  }
   0x3 LB: > { %s881_s28 = sadd.s32 4294967295, %s815_s27   ;;  %s670_s29 = sadd.s32 4294967294, %s815_s27   ;;  %s815_s27 = sphi %s866_s27, %s1068_s27   ;;  %s811_s26 = sphi %s864_s26, %s1067_s26   ;;  %s807_s25 = sphi %s862_s25, %s1066_s25   ;;  %s803_s24 = sphi %s860_s24, %s1065_s24  }
   0x4   : > { %s885_s30 = sadd.s32 1, %s815_s27   ;;  %s179_s8 = sadd.s32 1, %s811_s26 }
   0x5   : > { %s176_s9 = ssub.s32 %s815_s27, %s885_s30  ;;  %p189_p0 = scmp.ne.s32.totalorder %s811_s26, %s807_s25 }
   0x6   : > { %p177_p1 = scmp.eq.s32.totalorder %s176_s9, 0  ;;  %p190_p2 = scmp.eq.s32.totalorder %s881_s28, 1 }
   0x7   : > { %p195_p3 = scmp.ne.s32.totalorder %s807_s25, %s803_s24  ;;  %p196_p4 = scmp.eq.s32.totalorder %s670_s29, 1 }
   0x8   : > { %s896_s10 = scalar_select %p177_p1, %s811_s26, %s179_s8  }
   0x9   : > { %p898_p5 = por %p190_p2, %p189_p0  ;;  %p902_p6 = por %p196_p4, %p195_p3 }
   0xa   : > { %p673_p7 = scmp.ge.s32.totalorder %s815_s27, 1  ;;  %p239_p8 = scmp.lt.s32.totalorder %s815_s27, 3 }
   0xc   : > { %p240_p9 = pnand %p673_p7, %p239_p8 }
   0xd   : > { %p270_p10 = scmp.lt.s32.totalorder (!%p240_p9), %s881_s28, 1  ;;  %s817_s21 = smov (!%p240_p9), 32  }
   0xe   : > { %243 = sbr.rel (%p240_p9) target bundleno = 969 (0x3c9), region = 48  ;;  %s818_s13 = smov (!%p240_p9), 96  }
   0xf   : > { %s819_s14 = smov (!%p240_p9), 64   ;;  %s698_s22 = sshll.u32 (!%p240_p9), %s881_s28, 3 }
  0x10   : > { %s606_s9 = scalar_lea.hbm (!%p240_p9), %s1062_s7, %s698_s22 }
  0x11   : > { %s610_s17 = sshll.u32 (!%p240_p9), %s606_s9, 4  ;;  %s611_s17 = int_to_ptr.hbm [resolvable:$true] %s610_s17 }
  0x12   : > { %s767_s18 = sshra.s32 (!%p240_p9), %s611_s17, 4  ;;  %s768_s18 = int_to_ptr.hbm [resolvable:$true] %s767_s18 }
  0x13   : > { %v702_v0 = vld [vmem:[%s1056_s1 + $0x8] sm:$0xff]  ;;  %v914_v1 = vld [vmem:[%s1060_s5] sm:$0xff]  ;;  %s271_s19 = scalar_select %p270_p10, %s881_s28, 1  ;;  %vm297_vm0 = vcmask 261120   ;;  %vm460_vm1 = vcmask 523264  }
  0x14   : > { %v321_v2 = vrot.slane %v914_v1, 6  ;;  %v319_v3 = vrot.slane %v914_v1, 4  ;;  %307 = vmatpush.bf16.msra.mxu0 %v702_v0  ;;  %v701_v4 = vld [vmem:[%s1056_s1] sm:$0xff]  ;;  %v317_v5 = vrot.slane %v914_v1, 2  ;;  %v322_v9 = vrot.slane %v914_v1, 7  ;;  %p774_p0 = scmp.lt.s32.totalorder %s768_s18, %s1062_s7 }
  0x15   : > { %s675_s20 = sshll.u32 %s271_s19, 3  ;;  %v320_v10 = vrot.slane %v914_v1, 5  ;;  %v318_v12 = vrot.slane %v914_v1, 3  ;;  %v316_v17 = vrot.slane %v914_v1, 1  ;;  %v323_v18 = vperm.slane %v914_v1, 0  ;;  %s769_s19 = scalar_lea.hbm %s768_s18, 8 }
  0x16   : > { %v924_v6 = vperm.slane %v321_v2, 0  ;;  %v926_v7 = vperm.slane %v319_v3, 0  ;;  %v928_v8 = vperm.slane %v317_v5, 0  ;;  %s273_s29 = scalar_lea.vmem %s1055_s0, %s675_s20  ;;  %v330_v14 = vperm.slane %v322_v9, 0  ;;  %v747_v25 = vld [vmem:[%s1057_s2] ss:$0 sm:$0xff]  ;;  %p770_p11 = scmp.ne.s32.totalorder %s768_s18, %s769_s19 }
  0x17   : > { %v275_v11 = vld [vmem:[%s273_s29] sm:$0xff]  ;;  %v328_v15 = vperm.slane %v320_v10, 0  ;;  %v326_v16 = vperm.slane %v318_v12, 0  ;;  %v324_v19 = vperm.slane %v316_v17, 0 }
  0x18   : > { %343 = vrot.lane.b32.xlu0 %v924_v6, %s817_s21  ;;  %339 = vrot.lane.b32.xlu1 %v926_v7, %s817_s21  ;;  %v276_v13 = vpack.c.bf16 %v275_v11, %v275_v11  ;;  %p771_p12 = pnand %p770_p11, %p898_p5 }
  0x19   : > { %308 = vmatpush.bf16.msra.mxu0 %v701_v4  ;;  %335 = vrot.lane.b32.xlu2 %v928_v8, %s817_s21 }
  0x1a   : > { %p772_p13 = pneg %p771_p12 }
  0x1c   : > { %684 = vmatmul.msk.bf16.vlgmr.msra.gmra.mxu0 %vm297_vm0, %v276_v13 }
  0x20   : > { %345 = vrot.lane.b32.xlu0 %v330_v14, %s817_s21  ;;  %341 = vrot.lane.b32.xlu1 %v328_v15, %s817_s21 }
  0x21   : > { %337 = vrot.lane.b32.xlu2 %v326_v16, %s817_s21 }
  0x28   : > { %331 = vrot.lane.b32.xlu0 %v323_v18, %s817_s21  ;;  %333 = vrot.lane.b32.xlu1 %v324_v19, %s817_s21  ;;  %s267_s21 = sand.u32 1, %s807_s25  }
  0x29   : > { %s674_s23 = sshll.u32 %s267_s21, 3  ;;  %s596_s28 = scalar_lea.sflag [#allocation3], %s267_s21 }
  0x2a   : > { %s269_s15 = scalar_lea.vmem [#allocation2], %s674_s23  ;;  %s773_s23 = scalar_lea.hbm %s1062_s7, 16 }
  0x2b   : > { %s608_s16 = sshll.u32 %s269_s15, 4  ;;  %p775_p1 = scmp.lt.s32.totalorder %s773_s23, %s769_s19  ;;  %s609_s16 = int_to_ptr.vmem [resolvable:$true] %s608_s16 }
  0x2d   : > { %p776_p2 = por %p775_p1, %p774_p0 }
  0x2f   : > { %p777_p3 = pnand %p776_p2, %p772_p13 }
  0x73   : > { %v336_v22 = vpop.permute.xlu2 %335 }
  0x7b   : > { %v338_v27 = vpop.permute.xlu2 %337 }
  0x8a   : > { %v344_v20 = vpop.permute.xlu0 %343  ;;  %v340_v21 = vpop.permute.xlu1 %339 }
  0x92   : > { %v346_v23 = vpop.permute.xlu0 %345  ;;  %v342_v24 = vpop.permute.xlu1 %341 }
  0x99   : > { %v310_v26 = vpop.f32.mrf.mxu0 }
  0x9a   : > { %v945_v28 = vadd.f32 %v747_v25, %v310_v26  ;;  %v332_v29 = vpop.permute.xlu0 %331  ;;  %v334_v30 = vpop.permute.xlu1 %333 }
  0x9c   : > { %v357_v31 = vmul.f32 %v336_v22, %v945_v28  ;;  %v358_v32 = vmul.f32 %v338_v27, %v945_v28  ;;  %v361_v33 = vmul.f32 %v344_v20, %v945_v28  ;;  %v362_v34 = vmul.f32 %v346_v23, %v945_v28 }
  0x9d   : > { %v359_v35 = vmul.f32 %v340_v21, %v945_v28  ;;  %v360_v36 = vmul.f32 %v342_v24, %v945_v28  ;;  %v355_v37 = vmul.f32 %v332_v29, %v945_v28  ;;  %v356_v40 = vmul.f32 %v334_v30, %v945_v28 }
  0x9e   : > { %v398_v38 = vpack.c.bf16 %v357_v31, %v357_v31  ;;  %v399_v39 = vpack.c.bf16 %v358_v32, %v358_v32  ;;  %v402_v41 = vpack.c.bf16 %v361_v33, %v361_v33  ;;  %v403_v42 = vpack.c.bf16 %v362_v34, %v362_v34 }
  0x9f   : > { %v400_v43 = vpack.c.bf16 %v359_v35, %v359_v35  ;;  %v401_v44 = vpack.c.bf16 %v360_v36, %v360_v36  ;;  %v396_v53 = vpack.c.bf16 %v355_v37, %v355_v37  ;;  %v397_v54 = vpack.c.bf16 %v356_v40, %v356_v40 }
  0xa0   : > { %v414_v45 = vunpack.c.l.b16 %v398_v38  ;;  %v415_v46 = vunpack.c.l.b16 %v399_v39  ;;  %v418_v48 = vunpack.c.l.b16 %v402_v41  ;;  %v419_v49 = vunpack.c.l.b16 %v403_v42  ;;  %v474_v42 = vld [vmem:[%s1061_s6 + $0x38] sm:$0xff] }
  0xa1   : > { %v312_v47 = vpop.f32.mrf.mxu0  ;;  %v416_v50 = vunpack.c.l.b16 %v400_v43  ;;  %v417_v51 = vunpack.c.l.b16 %v401_v44  ;;  %v412_v57 = vunpack.c.l.b16 %v396_v53  ;;  %v413_v58 = vunpack.c.l.b16 %v397_v54  ;;  %v473_v43 = vld [vmem:[%s1061_s6 + $0x30] sm:$0xff]  ;;  %486 = vmatpush.msra.mxu2 %v474_v42  ;;  %v468_v54 = vld [vmem:[%s1061_s6 + $0x8] sm:$0xff] }
  0xa2   : > { %v421_v52 = vpack.c.b16 %v415_v46, %v414_v45  ;;  %v423_v55 = vpack.c.b16 %v419_v49, %v418_v48  ;;  %v395_v25 = vpack.c.bf16 %v945_v28, %v945_v28  ;;  %v469_v53 = vld [vmem:[%s1061_s6 + $0x10] sm:$0xff] }
  0xa3   : > { %v422_v56 = vpack.c.b16 %v417_v51, %v416_v50  ;;  %v420_v59 = vpack.c.b16 %v413_v58, %v412_v57  ;;  %487 = vmatpush.msra.mxu2 %v473_v43  ;;  %v472_v50 = vld [vmem:[%s1061_s6 + $0x28] sm:$0xff]  ;;  %v471_v51 = vld [vmem:[%s1061_s6 + $0x20] sm:$0xff] }
  0xa4   : > { %426 = vrot.lane.b32.xlu1 %v421_v52, %s818_s13  ;;  %430 = vrot.lane.b32.xlu2 %v423_v55, %s818_s13  ;;  %v470_v52 = vld [vmem:[%s1061_s6 + $0x18] sm:$0xff]  ;;  %v467_v55 = vld [vmem:[%s1061_s6] sm:$0xff] }
  0xa5   : > { %428 = vrot.lane.b32.xlu0 %v422_v56, %s818_s13  ;;  %488 = vmatpush.msra.mxu2 %v472_v50 }
  0xa7   : > { %489 = vmatpush.msra.mxu2 %v471_v51 }
  0xa9   : > { %490 = vmatpush.msra.mxu2 %v470_v52 }
  0xab   : > { %491 = vmatpush.msra.mxu2 %v469_v53 }
  0xac   : > { %375 = vrot.lane.b32.xlu1 %v924_v6, %s819_s14  ;;  %424 = vrot.lane.b32.xlu2 %v420_v59, %s818_s13 }
  0xad   : > { %492 = vmatpush.msra.mxu2 %v468_v54 }
  0xaf   : > { %493 = vmatpush.msra.mxu2 %v467_v55 }
  0xb4   : > { %371 = vrot.lane.b32.xlu1 %v926_v7, %s819_s14  ;;  %377 = vrot.lane.b32.xlu2 %v330_v14, %s819_s14 }
  0xbc   : > { %367 = vrot.lane.b32.xlu1 %v928_v8, %s819_s14  ;;  %373 = vrot.lane.b32.xlu2 %v328_v15, %s819_s14 }
  0xc4   : > { %363 = vrot.lane.b32.xlu1 %v323_v18, %s819_s14  ;;  %369 = vrot.lane.b32.xlu2 %v326_v16, %s819_s14 }
  0xcc   : > { %365 = vrot.lane.b32.xlu2 %v324_v19, %s819_s14 }
  0xfe   : > { %v431_v60 = vpop.permute.xlu2 %430 }
  0xff   : > { %v445_v61 = vsel %vm297_vm0, %v431_v60, 0  ;;  %v704_v60 = vld [vmem:[%s1058_s3 + $0x8] sm:$0xff] }
 0x100   : > { %451 = vmatpush.bf16.xpose.msra.mxu1 %v445_v61  ;;  %587 = vmatpush.bf16.msrb.mxu0 %v704_v60  ;;  %v703_v61 = vld [vmem:[%s1058_s3] sm:$0xff] }
 0x104   : > { %588 = vmatpush.bf16.msrb.mxu0 %v703_v61 }
 0x106   : > { %v425_v62 = vpop.permute.xlu2 %424 }
 0x107   : > { %v436_v18 = vsel %vm297_vm0, %v425_v62, 0 }
 0x10e   : > { %v378_v63 = vpop.permute.xlu2 %377 }
 0x10f   : > { %v394_v3 = vmul.f32 %v378_v63, %v945_v28 }
 0x111   : > { %v508_v6 = vpack.c.bf16 %v394_v3, %v394_v3 }
 0x113   : > { %v524_v10 = vunpack.c.l.b16 %v508_v6 }
 0x116   : > { %v427_v0 = vpop.permute.xlu1 %426  ;;  %v374_v4 = vpop.permute.xlu2 %373 }
 0x117   : > { %v429_v1 = vpop.permute.xlu0 %428  ;;  %v439_v8 = vsel %vm297_vm0, %v427_v0, 0  ;;  %v392_v11 = vmul.f32 %v374_v4, %v945_v28 }
 0x118   : > { %v442_v2 = vsel %vm297_vm0, %v429_v1, 0 }
 0x119   : > { %452 = vmatpush.bf16.xpose.msra.mxu1 %v442_v2  ;;  %v506_v16 = vpack.c.bf16 %v392_v11, %v392_v11 }
 0x11b   : > { %v522_v20 = vunpack.c.l.b16 %v506_v16 }
 0x11e   : > { %v376_v5 = vpop.permute.xlu1 %375  ;;  %v370_v14 = vpop.permute.xlu2 %369 }
 0x11f   : > { %v393_v7 = vmul.f32 %v376_v5, %v945_v28  ;;  %v390_v21 = vmul.f32 %v370_v14, %v945_v28  ;;  %v748_v5 = vld [vmem:[%s1059_s4] ss:$0 sm:$0xff] }
 0x121   : > { %v507_v9 = vpack.c.bf16 %v393_v7, %v393_v7  ;;  %453 = vmatpush.bf16.xpose.msra.mxu1 %v439_v8  ;;  %v504_v26 = vpack.c.bf16 %v390_v21, %v390_v21 }
 0x123   : > { %v523_v12 = vunpack.c.l.b16 %v507_v9  ;;  %v520_v31 = vunpack.c.l.b16 %v504_v26 }
 0x125   : > { %v528_v13 = vpack.c.b16 %v524_v10, %v523_v12 }
 0x126   : > { %v372_v15 = vpop.permute.xlu1 %371  ;;  %v366_v29 = vpop.permute.xlu2 %365 }
 0x127   : > { %v391_v17 = vmul.f32 %v372_v15, %v945_v28  ;;  %535 = vrot.lane.b32.xlu1 %v528_v13, %s819_s14  ;;  %v388_v32 = vmul.f32 %v366_v29, %v945_v28 }
 0x129   : > { %v505_v19 = vpack.c.bf16 %v391_v17, %v391_v17  ;;  %454 = vmatpush.bf16.xpose.msra.mxu1 %v436_v18  ;;  %v502_v36 = vpack.c.bf16 %v388_v32, %v388_v32 }
 0x12b   : > { %v521_v22 = vunpack.c.l.b16 %v505_v19  ;;  %v518_v39 = vunpack.c.l.b16 %v502_v36 }
 0x12d   : > { %v527_v23 = vpack.c.b16 %v522_v20, %v521_v22 }
 0x12e   : > { %v368_v24 = vpop.permute.xlu1 %367 }
 0x12f   : > { %v389_v27 = vmul.f32 %v368_v24, %v945_v28  ;;  %533 = vrot.lane.b32.xlu2 %v527_v23, %s819_s14 }
 0x130   : > { %685 = vmatmul.msk.bf16.vlgmr.msra.gmra.mxu1 %vm297_vm0, %v395_v25 }
 0x131   : > { %v503_v30 = vpack.c.bf16 %v389_v27, %v389_v27 }
 0x133   : > { %v519_v33 = vunpack.c.l.b16 %v503_v30 }
 0x135   : > { %v526_v34 = vpack.c.b16 %v520_v31, %v519_v33 }
 0x136   : > { %v364_v35 = vpop.permute.xlu1 %363 }
 0x137   : > { %v387_v37 = vmul.f32 %v364_v35, %v945_v28  ;;  %531 = vrot.lane.b32.xlu1 %v526_v34, %s819_s14 }
 0x139   : > { %v501_v38 = vpack.c.bf16 %v387_v37, %v387_v37 }
 0x13b   : > { %v517_v40 = vunpack.c.l.b16 %v501_v38 }
 0x13d   : > { %v525_v41 = vpack.c.b16 %v518_v39, %v517_v40 }
 0x13f   : > { %529 = vrot.lane.b32.xlu2 %v525_v41, %s819_s14 }
 0x189   : > { %v534_v28 = vpop.permute.xlu2 %533 }
 0x199   : > { %v536_v44 = vpop.permute.xlu1 %535  ;;  %v530_v46 = vpop.permute.xlu2 %529 }
 0x19a   : > { %548 = vmatpush.bf16.msra.mxu3 %v536_v44 }
 0x19e   : > { %549 = vmatpush.bf16.msra.mxu3 %v534_v28 }
 0x1a9   : > { %v532_v45 = vpop.permute.xlu1 %531 }
 0x1aa   : > { %550 = vmatpush.bf16.msra.mxu3 %v532_v45 }
 0x1ad   : > { %v456_v47 = vpop.f32.mrf.mxu1 }
 0x1ae   : > { %v461_v48 = vsel %vm460_vm1, %v456_v47, -inf  ;;  %551 = vmatpush.bf16.msra.mxu3 %v530_v46 }
 0x1af   : > { %462 = vmax.xlane.f32.xlu0 %v461_v48 }
 0x1b5   : > { %v458_v49 = vpop.f32.mrf.mxu1 }
 0x222   : > { %v463_v56 = vpop.xlane.xlu0 %462 }
 0x223   : > { %v464_v57 = vsub.f32 %v456_v47, %v463_v56 }
 0x225   : > { %v465_v58 = vmul.f32 1.442695, %v464_v57 }
 0x227   : > { %749 = vpow2.f32 %v465_v58 }
 0x22d   : > { %v750_v59 = vpop.eup %749 }
 0x22e   : > { %686 = vmatmul.msk.f32.vlgmr.msra.gmra.mxu2 %vm460_vm1, %v750_v59 }
 0x2b1   : > { %v495_v62 = vpop.f32.mrf.mxu2 }
 0x2b2   : > { %751 = vrcp.f32 %v495_v62 }
 0x2b8   : > { %v752_v63 = vpop.eup %751 }
 0x2b9   : > { %v499_v0 = vmul.f32 %v752_v63, %v750_v59 }
 0x2bb   : > { %v500_v1 = vpack.c.bf16 %v499_v0, %v499_v0 }
 0x2bd   : > { %687 = vmatmul.msk.bf16.vlgmr.msra.gmra.mxu3 %vm460_vm1, %v500_v1 }
 0x340   : > { %v553_v2 = vpop.f32.mrf.mxu3 }
 0x341   : > { %v557_v3 = vpack.c.bf16 %v553_v2, %v553_v2 }
 0x343   : > { %696 = vmatmul.msk.bf16.vlgmr.msrb.gmra.mxu0 %vm297_vm0, %v557_v3 }
 0x348   : > { %v555_v4 = vpop.f32.mrf.mxu3 }
 0x3c0   : > { %v590_v6 = vpop.f32.mrf.mxu0 }
 0x3c1   : > { %v591_v7 = vadd.f32 %v748_v5, %v590_v6 }
 0x3c3   : > { %594 = vst.msk [vmem:[%s269_s15] sm:$0xff] %vm297_vm0, %v591_v7 }
 0x3c4   : > { %780 = shalt.err (!%p777_p3)
}
 0x3c5   : > { %705 = dma.vmem_to_hbm [thread:$0]  (%p898_p5), %s609_s16, 128, %s611_s17, %s596_s28  }
 0x3c8   : > { %v592_v8 = vpop.f32.mrf.mxu0 }
 0x3c9 PF: > { %p711_p4 = scmp.ge.s32.totalorder %s815_s27, 2  ;;  %s622_s21 = sand.u32 1, %s803_s24  }
 0x3ca   : > { %s623_s9 = scalar_lea.sflag [#allocation3], %s622_s21 }
 0x3cb   : > { %p708_p7 = pnand %p711_p4, %p902_p6 }
 0x3cd   : > { %p709_p8 = pneg %p708_p7 }
 0x3cf   : > { %798 = dma.done.wait (%p709_p8), %s623_s9, 128  }
 0x3d0   : > { %800 = vsyncadd (%p709_p8), %s623_s9, 4294967168  ;;  %p17_p9 = scmp.ge.s32.totalorder %s885_s30, 4   ;;  %s1065_s24 = smov %s807_s25 }
 0x3d1   : > { %s1066_s25 = smov %s811_s26  ;;  %s1067_s26 = smov %s896_s10 }
 0x3d2   : > { %s1068_s27 = smov %s885_s30  ;;  %19 = sbr.rel (!%p17_p9) target bundleno = 3 (0x3), region = 83 }
 0x3d7   :  { %629 = vsyncpa [#allocation3], 1 }
 0x3d8   :  { %631 = vsyncpa [#allocation3 + $0x1], 1 }

</bundles_post_ra>
